<compile_context>
chip_gen: v7x
topology: tpu7x:2x2x1
jax: 0.10.0
libtpu: 0.0.40
codegen_flags: <defaults>
</compile_context>

<pallas_src>
import functools

import jax
import jax.numpy as jnp
from jax import lax
from jax.experimental import pallas as pl
from jax.experimental.pallas import tpu as pltpu

BN_EPS = 1e-5
_COMPUTE_DTYPE = jnp.bfloat16      # MXU input dtype (accumulation stays f32)
_LANES = 128
_SUBLANE_BF16 = 16                 # bf16 sublane packing (relayout-free reshape)


def _round_up(x, m):
    return ((x + m - 1) // m) * m


def _vmem_budget_bytes():
    """Generation-aware VMEM request: headroom below physical capacity."""
    phys = 128 * 1024 * 1024
    try:
        info = pltpu.get_tpu_info()
        phys = int(getattr(info, "vmem_capacity_bytes", phys))
    except Exception:
        pass
    # ~56 MiB on v7x (64 MiB/TC), capped at ~100 MiB on 128 MiB parts.
    return max(16 * 1024 * 1024, min(phys - 8 * 1024 * 1024, 100 * 1024 * 1024))


def _pick_tile_h(H, Wq, Wp, Cin, Cout, Cp_pad, n_rates, dmax, vmem_budget):
    """Largest divisor of H whose working set (weights double-buffered by the
    Pallas pipeline + 2-slot halo slab + output block + live intermediates)
    fits the VMEM budget."""
    bf2, f4 = 2, 4
    weight_bytes = 2 * bf2 * (Cin * Cout                       # 1x1 branch
                              + n_rates * 9 * Cin * Cout       # atrous
                              + (1 + n_rates) * Cout * Cp_pad)  # projection
    fixed = weight_bytes + 2 * (2 * dmax) * Wp * Cin * bf2 + 64 * 1024
    per_row = Wq * (2 * Cin * bf2            # halo slab (2 slots)
                    + 2 * Cp_pad * f4        # output block (double-buffered)
                    + Cp_pad * f4            # projection accumulator y
                    + 2 * Cout * f4          # branch f32 intermediates
                    + (2 + 2 * n_rates) * Cin * bf2)   # live column slabs
    usable = int(vmem_budget * 0.75) - fixed
    cap = max(1, usable // max(per_row, 1))
    tile_h = 1
    for t in range(1, H + 1):
        if H % t == 0 and t <= cap:
            tile_h = t
    # TODO(synk): if even tile_h=1 does not fit (huge W*Cin), add 2-D (H,W)
    # spatial tiling instead of a full-width slab.
    return tile_h


# --------------------- fused ASPP kernel (all conv branches + projection) ---


def _fused_aspp(xp, w0, b0, atrous_w, atrous_b, proj_w, bias_img, *,
                rates, tile_h, H, Wq, Wp, dmax, Cin, Cout, Cp_pad, vmem_limit):
    N = xp.shape[0]
    assert H % tile_h == 0
    HT = H // tile_h
    R = tile_h * Wq                     # output rows per grid step
    L = tile_h + 2 * dmax               # halo slab rows
    n_rates = len(rates)
    n_local = 1 + n_rates               # branches computed inside this kernel

    def kernel(*refs):
        i = 0
        xp_hbm = refs[i]; i += 1
        w0_r, b0_r = refs[i:i + 2]; i += 2
        aw = []
        for _ in range(n_rates):
            aw.append(refs[i:i + 2]); i += 2
        pw = refs[i:i + n_local]; i += n_local
        bias_r = refs[i]; i += 1
        o_ref = refs[i]; i += 1
        xbuf, sem = refs[i], refs[i + 1]

        n = pl.program_id(0)
        t = pl.program_id(1)
        nt = pl.num_programs(1)
        slot = t % 2

        def issue(tile_idx, slot_idx):
            pltpu.make_async_copy(
                xp_hbm.at[n, pl.ds(tile_idx * tile_h, L)],
                xbuf.at[slot_idx], sem.at[slot_idx]).start()

        # Prime the current tile at the first row-tile of each image...
        @pl.when(t == 0)
        def _():
            issue(0, 0)

        # ...and prefetch the next row-tile's halo slab while computing this
        # one (hides the per-step HBM read on the arbitrary row axis).
        # TODO(synk): cross-batch prefetch is skipped (batch axis may be
        # megacore-sharded, so the "next" n on this core is unknown).
        @pl.when(t + 1 < nt)
        def _():
            issue(t + 1, (t + 1) % 2)

        pltpu.make_async_copy(
            xp_hbm.at[n, pl.ds(t * tile_h, L)],
            xbuf.at[slot], sem.at[slot]).wait()

        xb = xbuf.at[slot]

        def col_slab(co):
            # One (L, Wq, Cin) sublane slice per column offset; shared by the
            # three kernel rows of every rate (and the 1x1 branch at co=dmax).
            return xb[:, co:co + Wq, :]

        def tap(slab, ro):
            # Leading-dim row slice + relayout-free reshape (Wq % 16 == 0).
            return slab[ro:ro + tile_h].reshape(R, Cin)

        center = col_slab(dmax)

        # --- 1x1 branch (BN folded into weights) -> projection slice ---
        xc = tap(center, dmax)
        h = jnp.maximum(
            jnp.dot(xc, w0_r[...], preferred_element_type=jnp.float32)
            + b0_r[...], 0.0)
        y = jnp.dot(h.astype(_COMPUTE_DTYPE), pw[0][...],
                    preferred_element_type=jnp.float32)

        # --- atrous 3x3 branches (9 taps from the shared halo slab) ---
        # TODO(synk): for small Cin an im2col K-concat (K = 9*Cin per matmul)
        # would raise MXU utilization; for production Cin (~2048) slice the
        # Cin axis on an extra "arbitrary" grid dim / Buffered(1) weights so
        # only a weight slice is VMEM-resident (v7x 64 MiB).
        for bi, d in enumerate(rates):
            wr, br = aw[bi]
            slabs = (col_slab(dmax - d), center, col_slab(dmax + d))
            acc = None
            for ki in range(3):
                ro = dmax + (ki - 1) * d
                for kj in range(3):
                    part = jnp.dot(tap(slabs[kj], ro), wr[ki * 3 + kj],
                                   preferred_element_type=jnp.float32)
                    acc = part if acc is None else acc + part
            hb = jnp.maximum(acc + br[...], 0.0)
            y = y + jnp.dot(hb.astype(_COMPUTE_DTYPE), pw[1 + bi][...],
                            preferred_element_type=jnp.float32)

        # --- per-image bias = pool-branch projection + projection BN bias,
        #     final ReLU (Dropout(0.5) is identity in eval mode) ---
        y = jnp.maximum(y + bias_r[...], 0.0)
        o_ref[...] = y.reshape(tile_h, Wq, Cp_pad).astype(o_ref.dtype)

    in_specs = [pl.BlockSpec(memory_space=pl.ANY),
                pl.BlockSpec((Cin, Cout), lambda n, t: (0, 0)),
                pl.BlockSpec((1, Cout), lambda n, t: (0, 0))]
    args = [xp, w0, b0]
    for wr, br in zip(atrous_w, atrous_b):
        in_specs += [pl.BlockSpec((9, Cin, Cout), lambda n, t: (0, 0, 0)),
                     pl.BlockSpec((1, Cout), lambda n, t: (0, 0))]
        args += [wr, br]
    for pwb in proj_w:
        in_specs.append(pl.BlockSpec((Cout, Cp_pad), lambda n, t: (0, 0)))
        args.append(pwb)
    in_specs.append(pl.BlockSpec((None, 1, Cp_pad), lambda n, t: (n, 0, 0)))
    args.append(bias_img)

    return pl.pallas_call(
        kernel,
        out_shape=jax.ShapeDtypeStruct((N, H, Wq, Cp_pad), jnp.float32),
        grid=(N, HT),
        in_specs=in_specs,
        out_specs=pl.BlockSpec((None, tile_h, Wq, Cp_pad),
                               lambda n, t: (n, t, 0, 0)),
        scratch_shapes=[pltpu.VMEM((2, L, Wp, Cin), xp.dtype),
                        pltpu.SemaphoreType.DMA((2,))],
        compiler_params=pltpu.CompilerParams(
            dimension_semantics=("parallel", "arbitrary"),
            vmem_limit_bytes=int(vmem_limit)),
    )(*args)


# --------------------- global average pooling (tiled f32 reduction) ---------


def _gap_kernel(x_ref, o_ref, acc_ref, *, inv_hw):
    @pl.when(pl.program_id(0) == 0)
    def _():
        acc_ref[...] = jnp.zeros_like(acc_ref)

    acc_ref[...] += jnp.sum(x_ref[...].astype(jnp.float32), axis=1)

    @pl.when(pl.program_id(0) == pl.num_programs(0) - 1)
    def _():
        o_ref[...] = acc_ref[...] * inv_hw


def _pick_gap_chunk(HW, cap=2048):
    if HW <= cap:
        return HW
    best = None
    c = 8
    while c <= cap:
        if HW % c == 0:
            best = c
        c += 8
    return best if best is not None else HW


def global_avg_pool(x3):
    """AdaptiveAvgPool2d(1): tiled f32 mean over the flattened H*W axis."""
    N, HW, C = x3.shape
    chunk = _pick_gap_chunk(HW)
    return pl.pallas_call(
        functools.partial(_gap_kernel, inv_hw=1.0 / HW),
        out_shape=jax.ShapeDtypeStruct((N, C), jnp.float32),
        grid=(HW // chunk,),
        in_specs=[pl.BlockSpec((N, chunk, C), lambda t: (0, t, 0))],
        out_specs=pl.BlockSpec((N, C), lambda t: (0, 0)),
        scratch_shapes=[pltpu.VMEM((N, C), jnp.float32)],
        compiler_params=pltpu.CompilerParams(
            dimension_semantics=("arbitrary",)),
    )(x3)


# --------------------- pooling branch -> per-image projection bias ----------


def _pool_branch_kernel(g_ref, w_ref, b_ref, p_ref, pb_ref, o_ref):
    h = jnp.maximum(
        jnp.dot(g_ref[...], w_ref[...], preferred_element_type=jnp.float32)
        + b_ref[...], 0.0)
    o_ref[...] = (jnp.dot(h, p_ref[...], preferred_element_type=jnp.float32)
                  + pb_ref[...])


def pool_branch(pooled, w, b, pproj, bproj):
    """(N,Cin) GAP -> 1x1 conv (+folded BN) + ReLU -> projection slice + bias."""
    N, Cin = pooled.shape
    Cout = w.shape[1]
    Cp_pad = pproj.shape[1]
    return pl.pallas_call(
        _pool_branch_kernel,
        out_shape=jax.ShapeDtypeStruct((N, Cp_pad), jnp.float32),
        grid=(1,),
        in_specs=[pl.BlockSpec((N, Cin), lambda i: (0, 0)),
                  pl.BlockSpec((Cin, Cout), lambda i: (0, 0)),
                  pl.BlockSpec((1, Cout), lambda i: (0, 0)),
                  pl.BlockSpec((Cout, Cp_pad), lambda i: (0, 0)),
                  pl.BlockSpec((1, Cp_pad), lambda i: (0, 0))],
        out_specs=pl.BlockSpec((N, Cp_pad), lambda i: (0, 0)),
    )(pooled, w, b, pproj, bproj)


# ----------------------------- parameters -----------------------------------


def make_params(key, in_channels, atrous_rates, out_channels, eps=BN_EPS):
    """Deterministic synthetic weights; eval-mode BN folded to scale/bias."""
    n_branches = 2 + len(atrous_rates)
    keys = jax.random.split(key, 2 * n_branches + 2)

    def fold_bn(kk, c):
        kg, kb, km, kv = jax.random.split(kk, 4)
        gamma = 1.0 + 0.1 * jax.random.normal(kg, (c,), jnp.float32)
        beta = 0.1 * jax.random.normal(kb, (c,), jnp.float32)
        mean = 0.1 * jax.random.normal(km, (c,), jnp.float32)
        var = 0.5 + jnp.abs(jax.random.normal(kv, (c,), jnp.float32))
        scale = gamma / jnp.sqrt(var + eps)
        bias = beta - mean * scale
        return scale, bias

    params = {}
    w = 0.1 * jax.random.normal(keys[0], (out_channels, in_channels, 1, 1),
                                jnp.float32)
    s, b = fold_bn(keys[1], out_channels)
    params['branch0'] = dict(w=w, scale=s, bias=b)

    params['atrous'] = []
    idx = 2
    for _ in atrous_rates:
        w = 0.1 * jax.random.normal(keys[idx],
                                    (out_channels, in_channels, 3, 3),
                                    jnp.float32)
        s, b = fold_bn(keys[idx + 1], out_channels)
        params['atrous'].append(dict(w=w, scale=s, bias=b))
        idx += 2

    w = 0.1 * jax.random.normal(keys[idx], (out_channels, in_channels, 1, 1),
                                jnp.float32)
    s, b = fold_bn(keys[idx + 1], out_channels)
    params['pool'] = dict(w=w, scale=s, bias=b)
    idx += 2

    n_convs = 2 + len(atrous_rates)
    w = 0.1 * jax.random.normal(
        keys[idx], (out_channels, n_convs * out_channels, 1, 1), jnp.float32)
    s, b = fold_bn(keys[idx + 1], out_channels)
    params['project'] = dict(w=w, scale=s, bias=b)
    return params


# ----------------------------- ASPP forward (Pallas) ------------------------


def aspp_forward_pallas(x_nchw, params, atrous_rates):
    rates = list(atrous_rates)
    N, Cin, H, W = x_nchw.shape
    Cout = int(params['branch0']['scale'].shape[0])
    Cp = int(params['project']['scale'].shape[0])
    Cp_pad = _round_up(Cp, _LANES)          # lane-dense output stores
    dmax = max(rates) if rates else 0
    cdt = _COMPUTE_DTYPE
    f32 = jnp.float32

    # Sublane-aligned widths: Wq multiple of 16 makes the per-tap
    # (tile_h, Wq, Cin) -> (R, Cin) reshape relayout-free and R a multiple of 8.
    Wq = _round_up(W, _SUBLANE_BF16)
    Wp = _round_up(Wq + 2 * dmax, 8)

    vmem_budget = _vmem_budget_bytes()
    tile_h = _pick_tile_h(H, Wq, Wp, Cin, Cout, Cp_pad, len(rates), dmax,
                          vmem_budget)

    # NCHW -> NHWC (channels on lanes).  GAP runs on the f32 copy; the conv
    # branches read one zero-padded bf16 copy shared by every atrous rate.
    x_nhwc = jnp.transpose(x_nchw, (0, 2, 3, 1))
    xp = jnp.pad(x_nhwc.astype(cdt),
                 ((0, 0), (dmax, dmax), (dmax, Wp - dmax - W), (0, 0)))

    # Fold eval-mode BN scales into the conv weights (per output channel).
    p0 = params['branch0']
    w0 = (p0['w'][:, :, 0, 0].T * p0['scale'][None, :]).astype(cdt)
    b0 = p0['bias'].reshape(1, Cout).astype(f32)
    aw, ab = [], []
    for p in params['atrous']:
        wr = jnp.transpose(p['w'], (2, 3, 1, 0)).reshape(9, Cin, Cout)
        aw.append((wr * p['scale'][None, None, :]).astype(cdt))
        ab.append(p['bias'].reshape(1, Cout).astype(f32))

    # Projection weight split per branch (torch.cat order: 1x1, atrous..., pool)
    # with the projection BN scale folded in and Cp padded to Cp_pad lanes.
    wproj = (params['project']['w'][:, :, 0, 0].T
             * params['project']['scale'][None, :])
    pw_f32 = []
    for bidx in range(2 + len(rates)):
        blk = wproj[bidx * Cout:(bidx + 1) * Cout, :]
        pw_f32.append(jnp.pad(blk, ((0, 0), (0, Cp_pad - Cp))))
    b_proj = jnp.pad(params['project']['bias'], (0, Cp_pad - Cp)
                     ).reshape(1, Cp_pad).astype(f32)

    # Pooling branch: f32 tiled GAP -> 1x1 conv (+folded BN) + ReLU -> its
    # projection slice, combined with the projection bias into ONE per-image
    # bias row consumed by the fused kernel.
    pooled = global_avg_pool(x_nhwc.astype(f32).reshape(N, H * W, Cin))
    pp = params['pool']
    wpool = (pp['w'][:, :, 0, 0].T * pp['scale'][None, :]).astype(f32)
    bias_img = pool_branch(pooled, wpool,
                           pp['bias'].reshape(1, Cout).astype(f32),
                           pw_f32[-1].astype(f32), b_proj)
    bias_img = bias_img.reshape(N, 1, Cp_pad)

    # Fused main kernel: 1x1 + atrous branches + projection, per row-tile.
    out4 = _fused_aspp(xp, w0, b0, aw, ab,
                       [p.astype(cdt) for p in pw_f32[:1 + len(rates)]],
                       bias_img,
                       rates=rates, tile_h=tile_h, H=H, Wq=Wq, Wp=Wp,
                       dmax=dmax, Cin=Cin, Cout=Cout, Cp_pad=Cp_pad,
                       vmem_limit=vmem_budget)

    # TODO(synk): if the downstream consumer accepts NHWC/bf16, emit bf16 from
    # the kernel and skip this slice + transpose to save output HBM passes.
    y = out4[:, :, :W, :Cp]
    return jnp.transpose(y, (0, 3, 1, 2))


# ----------------------------- pure-JAX reference ---------------------------


def aspp_forward_ref(x, params, atrous_rates):
    def bn_relu(y, scale, bias):
        return jnp.maximum(
            y * scale[None, :, None, None] + bias[None, :, None, None], 0.0)

    def c1x1(x, w):
        return lax.conv_general_dilated(
            x, w, (1, 1), 'VALID', dimension_numbers=('NCHW', 'OIHW', 'NCHW'))

    outs = []
    p = params['branch0']
    outs.append(bn_relu(c1x1(x, p['w']), p['scale'], p['bias']))
    for r, p in zip(atrous_rates, params['atrous']):
        y = lax.conv_general_dilated(
            x, p['w'], (1, 1), [(r, r), (r, r)], rhs_dilation=(r, r),
            dimension_numbers=('NCHW', 'OIHW', 'NCHW'))
        outs.append(bn_relu(y, p['scale'], p['bias']))
    p = params['pool']
    pooled = jnp.mean(x, axis=(2, 3), keepdims=True)
    y = bn_relu(c1x1(pooled, p['w']), p['scale'], p['bias'])
    N, _, H, W = x.shape
    outs.append(jnp.broadcast_to(y, (N, y.shape[1], H, W)))
    cat = jnp.concatenate(outs, axis=1)
    p = params['project']
    return bn_relu(c1x1(cat, p['w']), p['scale'], p['bias'])


# ----------------------------- main ------------------------------------------


if __name__ == "__main__":
    in_channels, out_channels = 4, 8
    atrous_rates = [2, 3]
    N, H, W = 2, 16, 16

    x = jax.random.normal(jax.random.PRNGKey(0), (N, in_channels, H, W),
                          dtype=jnp.float32)
    params = make_params(jax.random.PRNGKey(42), in_channels, atrous_rates,
                         out_channels)

    out = jax.block_until_ready(aspp_forward_pallas(x, params, atrous_rates))
    assert out.shape == (N, out_channels, H, W), out.shape

    ref = aspp_forward_ref(x, params, atrous_rates)
    max_err = float(jnp.max(jnp.abs(out - ref)))
    mean_err = float(jnp.mean(jnp.abs(out - ref)))
    # bf16 MXU inputs with f32 accumulation: tolerance sized for bf16 rounding.
    assert max_err < 5e-2 and mean_err < 1e-2, (max_err, mean_err)

    print("KERNEL_OK")
</pallas_src>

<mosaic_0001>
module attributes {stable_mosaic.version = 11 : i64} {
  func.func @_gap_kernel(%arg0: i32, %arg1: memref<2x256x4xf32, #tpu.memory_space<vmem>>, %arg2: memref<2x4xf32, #tpu.memory_space<vmem>>, %arg3: memref<2x4xf32, #tpu.memory_space<vmem>>) attributes {dimension_semantics = [#tpu.dimension_semantics<arbitrary>], iteration_bounds = array<i64: 1>, scalar_prefetch = 0 : i64, scratch_operands = 1 : i64, tpu.core_type = #tpu.core_type<tc>, window_params = [{transform_indices = @transform_0, window_bounds = array<i64: 2, 256, 4>}, {pipeline_mode = #tpu.pipeline_mode<synchronous>, transform_indices = @transform_1, window_bounds = array<i64: 2, 4>}]} {
    %c0_i32 = arith.constant 0 : i32
    %0 = arith.cmpi eq, %arg0, %c0_i32 : i32
    %1 = arith.extui %0 : i1 to i32
    %c0_i32_0 = arith.constant 0 : i32
    %2 = arith.cmpi ne, %1, %c0_i32_0 : i32
    scf.if %2 {
      %cst_9 = arith.constant 0.000000e+00 : f32
      %11 = vector.broadcast %cst_9 : f32 to vector<2x4xf32>
      %c0_10 = arith.constant 0 : index
      %c0_11 = arith.constant 0 : index
      %12 = vector.load %arg3[%c0_10, %c0_11] : memref<2x4xf32, #tpu.memory_space<vmem>>, vector<2x4xf32>
      tpu.vector_store %arg3[%c0_10, %c0_11], %11 {strides = array<i32>} : memref<2x4xf32, #tpu.memory_space<vmem>>, vector<2x4xf32>,
    } else {
    }
    %c0 = arith.constant 0 : index
    %c0_1 = arith.constant 0 : index
    %3 = vector.load %arg3[%c0, %c0_1] : memref<2x4xf32, #tpu.memory_space<vmem>>, vector<2x4xf32>
    %c0_2 = arith.constant 0 : index
    %c0_3 = arith.constant 0 : index
    %c0_4 = arith.constant 0 : index
    %4 = vector.load %arg1[%c0_2, %c0_3, %c0_4] : memref<2x256x4xf32, #tpu.memory_space<vmem>>, vector<2x256x4xf32>
    %cst = arith.constant dense<0.000000e+00> : vector<2x4xf32>
    %5 = vector.multi_reduction <add>, %4, %cst [1] : vector<2x256x4xf32> to vector<2x4xf32>
    %6 = arith.addf %3, %5 : vector<2x4xf32>
    %c0_5 = arith.constant 0 : index
    %c0_6 = arith.constant 0 : index
    %7 = vector.load %arg3[%c0_5, %c0_6] : memref<2x4xf32, #tpu.memory_space<vmem>>, vector<2x4xf32>
    tpu.vector_store %arg3[%c0_5, %c0_6], %6 {strides = array<i32>} : memref<2x4xf32, #tpu.memory_space<vmem>>, vector<2x4xf32>,
    %c0_i32_7 = arith.constant 0 : i32
    %8 = arith.cmpi eq, %arg0, %c0_i32_7 : i32
    %9 = arith.extui %8 : i1 to i32
    %c0_i32_8 = arith.constant 0 : i32
    %10 = arith.cmpi ne, %9, %c0_i32_8 : i32
    scf.if %10 {
      %c0_9 = arith.constant 0 : index
      %c0_10 = arith.constant 0 : index
      %11 = vector.load %arg3[%c0_9, %c0_10] : memref<2x4xf32, #tpu.memory_space<vmem>>, vector<2x4xf32>
      %cst_11 = arith.constant 3.906250e-03 : f32
      %12 = vector.broadcast %cst_11 : f32 to vector<2x4xf32>
      %13 = arith.mulf %11, %12 : vector<2x4xf32>
      %c0_12 = arith.constant 0 : index
      %c0_13 = arith.constant 0 : index
      %14 = vector.load %arg2[%c0_12, %c0_13] : memref<2x4xf32, #tpu.memory_space<vmem>>, vector<2x4xf32>
      tpu.vector_store %arg2[%c0_12, %c0_13], %13 {strides = array<i32>} : memref<2x4xf32, #tpu.memory_space<vmem>>, vector<2x4xf32>,
    } else {
    }
    return
  }
  func.func @transform_0(%arg0: i32) -> (i32, i32, i32) {
    %c0_i32 = arith.constant 0 : i32
    %c0_i32_0 = arith.constant 0 : i32
    %c0_i32_1 = arith.constant 0 : i32
    return %c0_i32, %arg0, %c0_i32_0 : i32, i32, i32
  }
  func.func @transform_1(%arg0: i32) -> (i32, i32) {
    %c0_i32 = arith.constant 0 : i32
    %c0_i32_0 = arith.constant 0 : i32
    %c0_i32_1 = arith.constant 0 : i32
    return %c0_i32, %c0_i32_0 : i32, i32
  }
}

</mosaic_0001>

<bundles_post_ra>
// kernel: tpu_custom_call.1
= control target key start
LH: loop header
LB: loop body
LE: loop exit
PB: predicated region body
PF: predicated region fallthrough
CT: control target
= control target key end

     0   :  { %vm13_vm0 = vcmask 25600   ;;  %vm80_vm1 = vcmask 31744   ;;  %v273_v3 = vmov 0.0   ;;  %s556_s0 = inlined_call_operand.vmem [shape: f32[2,256,4], index: 0, kind: input, shape index: {}]   ;;  %s557_s1 = inlined_call_operand.hbm [shape: f32[2,4], index: 1, kind: output, shape index: {}]  }
   0x1   :  { %v16_v0 = vld [vmem:[%s556_s0] sm:$0xff]  ;;  %v17_v1 = vld [vmem:[%s556_s0 + $0x8] sm:$0xff]  ;;  %v18_v2 = vld [vmem:[%s556_s0 + $0x10] sm:$0xff]  ;;  %14 = vst.msk [vmem:[#allocation2] sm:$0x3] %vm13_vm0, %v273_v3 }
   0x2   :  { %v19_v4 = vld [vmem:[%s556_s0 + $0x18] sm:$0xff]  ;;  %v81_v5 = vsel %vm80_vm1, %v16_v0, 0.0  ;;  %v82_v6 = vsel %vm80_vm1, %v17_v1, 0.0  ;;  %v84_v7 = vsel %vm80_vm1, %v18_v2, 0.0  ;;  %v20_v8 = vld [vmem:[%s556_s0 + $0x20] sm:$0xff]  ;;  %v21_v11 = vld [vmem:[%s556_s0 + $0x28] sm:$0xff] }
   0x3   :  { %v83_v9 = vadd.f32 %v82_v6, %v81_v5  ;;  %v86_v10 = vsel %vm80_vm1, %v19_v4, 0.0  ;;  %v88_v13 = vsel %vm80_vm1, %v20_v8, 0.0  ;;  %v22_v14 = vld [vmem:[%s556_s0 + $0x30] sm:$0xff]  ;;  %v90_v16 = vsel %vm80_vm1, %v21_v11, 0.0  ;;  %v23_v17 = vld [vmem:[%s556_s0 + $0x38] sm:$0xff]  ;;  %v24_v20 = vld [vmem:[%s556_s0 + $0x40] sm:$0xff] }
   0x4   :  { %v92_v19 = vsel %vm80_vm1, %v22_v14, 0.0  ;;  %v48_v22 = vld [vmem:[%s556_s0 + $0x100] sm:$0xff]  ;;  %v49_v23 = vld [vmem:[%s556_s0 + $0x108] sm:$0xff]  ;;  %v50_v24 = vld [vmem:[%s556_s0 + $0x110] sm:$0xff]  ;;  %v94_v25 = vsel %vm80_vm1, %v23_v17, 0.0  ;;  %v96_v33 = vsel %vm80_vm1, %v24_v20, 0.0 }
   0x5   :  { %v85_v12 = vadd.f32 %v84_v7, %v83_v9  ;;  %v25_v26 = vld [vmem:[%s556_s0 + $0x48] sm:$0xff]  ;;  %v51_v27 = vld [vmem:[%s556_s0 + $0x118] sm:$0xff]  ;;  %v150_v29 = vsel %vm80_vm1, %v48_v22, 0.0  ;;  %v151_v30 = vsel %vm80_vm1, %v49_v23, 0.0  ;;  %v153_v31 = vsel %vm80_vm1, %v50_v24, 0.0  ;;  %v52_v32 = vld [vmem:[%s556_s0 + $0x120] sm:$0xff] }
   0x6   :  { %v152_v34 = vadd.f32 %v151_v30, %v150_v29  ;;  %v26_v35 = vld [vmem:[%s556_s0 + $0x50] sm:$0xff]  ;;  %v155_v37 = vsel %vm80_vm1, %v51_v27, 0.0  ;;  %v53_v38 = vld [vmem:[%s556_s0 + $0x128] sm:$0xff]  ;;  %v98_v39 = vsel %vm80_vm1, %v25_v26, 0.0  ;;  %v27_v41 = vld [vmem:[%s556_s0 + $0x58] sm:$0xff]  ;;  %v157_v43 = vsel %vm80_vm1, %v52_v32, 0.0 }
   0x7   :  { %v87_v15 = vadd.f32 %v86_v10, %v85_v12  ;;  %v54_v44 = vld [vmem:[%s556_s0 + $0x130] sm:$0xff]  ;;  %v100_v45 = vsel %vm80_vm1, %v26_v35, 0.0  ;;  %v28_v47 = vld [vmem:[%s556_s0 + $0x60] sm:$0xff]  ;;  %v159_v49 = vsel %vm80_vm1, %v53_v38, 0.0  ;;  %v55_v50 = vld [vmem:[%s556_s0 + $0x138] sm:$0xff]  ;;  %v102_v51 = vsel %vm80_vm1, %v27_v41, 0.0 }
   0x8   :  { %v154_v40 = vadd.f32 %v153_v31, %v152_v34  ;;  %v29_v53 = vld [vmem:[%s556_s0 + $0x68] sm:$0xff]  ;;  %v161_v55 = vsel %vm80_vm1, %v54_v44, 0.0  ;;  %v56_v56 = vld [vmem:[%s556_s0 + $0x140] sm:$0xff]  ;;  %v104_v57 = vsel %vm80_vm1, %v28_v47, 0.0  ;;  %v30_v59 = vld [vmem:[%s556_s0 + $0x70] sm:$0xff]  ;;  %v163_v61 = vsel %vm80_vm1, %v55_v50, 0.0 }
   0x9   :  { %v89_v18 = vadd.f32 %v88_v13, %v87_v15 }
   0xa   :  { %v156_v46 = vadd.f32 %v155_v37, %v154_v40 }
   0xb   :  { %v91_v21 = vadd.f32 %v90_v16, %v89_v18 }
   0xc   :  { %v158_v52 = vadd.f32 %v157_v43, %v156_v46 }
   0xd   :  { %v93_v28 = vadd.f32 %v92_v19, %v91_v21 }
   0xe   :  { %v160_v58 = vadd.f32 %v159_v49, %v158_v52 }
   0xf   :  { %v95_v36 = vadd.f32 %v94_v25, %v93_v28 }
  0x11   :  { %v97_v42 = vadd.f32 %v96_v33, %v95_v36 }
  0x13   :  { %v99_v48 = vadd.f32 %v98_v39, %v97_v42 }
  0x15   :  { %v101_v54 = vadd.f32 %v100_v45, %v99_v48 }
  0x17   :  { %v103_v60 = vadd.f32 %v102_v51, %v101_v54 }
  0x18   :  { %6 = vsyncpa [#allocation4], 0  ;;  %v57_v62 = vld [vmem:[%s556_s0 + $0x148] sm:$0xff]  ;;  %v106_v63 = vsel %vm80_vm1, %v29_v53, 0.0  ;;  %v162_v0 = vadd.f32 %v161_v55, %v160_v58  ;;  %v31_v1 = vld [vmem:[%s556_s0 + $0x78] sm:$0xff]  ;;  %v165_v3 = vsel %vm80_vm1, %v56_v56, 0.0 }
  0x19   :  { %v105_v2 = vadd.f32 %v104_v57, %v103_v60  ;;  %v58_v4 = vld [vmem:[%s556_s0 + $0x150] sm:$0xff]  ;;  %v108_v5 = vsel %vm80_vm1, %v30_v59, 0.0  ;;  %v32_v7 = vld [vmem:[%s556_s0 + $0x80] sm:$0xff]  ;;  %v167_v9 = vsel %vm80_vm1, %v57_v62, 0.0  ;;  %v59_v10 = vld [vmem:[%s556_s0 + $0x158] sm:$0xff]  ;;  %v110_v11 = vsel %vm80_vm1, %v31_v1, 0.0 }
  0x1a   :  { %v164_v6 = vadd.f32 %v163_v61, %v162_v0  ;;  %v33_v13 = vld [vmem:[%s556_s0 + $0x88] sm:$0xff]  ;;  %v169_v15 = vsel %vm80_vm1, %v58_v4, 0.0  ;;  %v60_v16 = vld [vmem:[%s556_s0 + $0x160] sm:$0xff]  ;;  %v112_v17 = vsel %vm80_vm1, %v32_v7, 0.0  ;;  %v34_v19 = vld [vmem:[%s556_s0 + $0x90] sm:$0xff]  ;;  %v171_v21 = vsel %vm80_vm1, %v59_v10, 0.0 }
  0x1b   :  { %v107_v8 = vadd.f32 %v106_v63, %v105_v2  ;;  %v61_v22 = vld [vmem:[%s556_s0 + $0x168] sm:$0xff]  ;;  %v114_v23 = vsel %vm80_vm1, %v33_v13, 0.0  ;;  %v35_v25 = vld [vmem:[%s556_s0 + $0x98] sm:$0xff]  ;;  %v173_v27 = vsel %vm80_vm1, %v60_v16, 0.0  ;;  %v62_v28 = vld [vmem:[%s556_s0 + $0x170] sm:$0xff]  ;;  %v116_v29 = vsel %vm80_vm1, %v34_v19, 0.0 }
  0x1c   :  { %v166_v12 = vadd.f32 %v165_v3, %v164_v6  ;;  %v36_v31 = vld [vmem:[%s556_s0 + $0xa0] sm:$0xff]  ;;  %v175_v33 = vsel %vm80_vm1, %v61_v22, 0.0  ;;  %v63_v34 = vld [vmem:[%s556_s0 + $0x178] sm:$0xff]  ;;  %v118_v35 = vsel %vm80_vm1, %v35_v25, 0.0  ;;  %v37_v37 = vld [vmem:[%s556_s0 + $0xa8] sm:$0xff]  ;;  %v177_v39 = vsel %vm80_vm1, %v62_v28, 0.0 }
  0x1d   :  { %v109_v14 = vadd.f32 %v108_v5, %v107_v8  ;;  %v64_v40 = vld [vmem:[%s556_s0 + $0x180] sm:$0xff]  ;;  %v120_v41 = vsel %vm80_vm1, %v36_v31, 0.0  ;;  %v38_v43 = vld [vmem:[%s556_s0 + $0xb0] sm:$0xff]  ;;  %v179_v45 = vsel %vm80_vm1, %v63_v34, 0.0  ;;  %v65_v46 = vld [vmem:[%s556_s0 + $0x188] sm:$0xff]  ;;  %v122_v47 = vsel %vm80_vm1, %v37_v37, 0.0 }
  0x1e   :  { %v168_v18 = vadd.f32 %v167_v9, %v166_v12  ;;  %v39_v49 = vld [vmem:[%s556_s0 + $0xb8] sm:$0xff]  ;;  %v181_v51 = vsel %vm80_vm1, %v64_v40, 0.0  ;;  %v66_v52 = vld [vmem:[%s556_s0 + $0x190] sm:$0xff]  ;;  %v124_v53 = vsel %vm80_vm1, %v38_v43, 0.0  ;;  %v40_v55 = vld [vmem:[%s556_s0 + $0xc0] sm:$0xff]  ;;  %v183_v57 = vsel %vm80_vm1, %v65_v46, 0.0 }
  0x1f   :  { %v111_v20 = vadd.f32 %v110_v11, %v109_v14  ;;  %v67_v58 = vld [vmem:[%s556_s0 + $0x198] sm:$0xff]  ;;  %v126_v59 = vsel %vm80_vm1, %v39_v49, 0.0  ;;  %v41_v61 = vld [vmem:[%s556_s0 + $0xc8] sm:$0xff]  ;;  %v185_v63 = vsel %vm80_vm1, %v66_v52, 0.0  ;;  %v68_v0 = vld [vmem:[%s556_s0 + $0x1a0] sm:$0xff]  ;;  %v128_v1 = vsel %vm80_vm1, %v40_v55, 0.0 }
  0x20   :  { %v170_v24 = vadd.f32 %v169_v15, %v168_v18  ;;  %v42_v3 = vld [vmem:[%s556_s0 + $0xd0] sm:$0xff]  ;;  %v187_v5 = vsel %vm80_vm1, %v67_v58, 0.0  ;;  %v69_v6 = vld [vmem:[%s556_s0 + $0x1a8] sm:$0xff]  ;;  %v130_v7 = vsel %vm80_vm1, %v41_v61, 0.0  ;;  %v43_v9 = vld [vmem:[%s556_s0 + $0xd8] sm:$0xff]  ;;  %v189_v11 = vsel %vm80_vm1, %v68_v0, 0.0 }
  0x21   :  { %v113_v26 = vadd.f32 %v112_v17, %v111_v20  ;;  %v70_v12 = vld [vmem:[%s556_s0 + $0x1b0] sm:$0xff]  ;;  %v132_v13 = vsel %vm80_vm1, %v42_v3, 0.0  ;;  %v44_v15 = vld [vmem:[%s556_s0 + $0xe0] sm:$0xff]  ;;  %v191_v17 = vsel %vm80_vm1, %v69_v6, 0.0  ;;  %v71_v18 = vld [vmem:[%s556_s0 + $0x1b8] sm:$0xff]  ;;  %v134_v19 = vsel %vm80_vm1, %v43_v9, 0.0 }
  0x22   :  { %v172_v30 = vadd.f32 %v171_v21, %v170_v24  ;;  %v45_v21 = vld [vmem:[%s556_s0 + $0xe8] sm:$0xff]  ;;  %v72_v24 = vld [vmem:[%s556_s0 + $0x1c0] sm:$0xff]  ;;  %v136_v25 = vsel %vm80_vm1, %v44_v15, 0.0  ;;  %vm221_vm2 = vcmask 1041409  }
  0x23   :  { %v115_v32 = vadd.f32 %v114_v23, %v113_v26  ;;  %v193_v23 = vsel %vm80_vm1, %v70_v12, 0.0  ;;  %v138_v31 = vsel %vm80_vm1, %v45_v21, 0.0  ;;  %v76_v46 = vld [vmem:[%s556_s0 + $0x1e0] sm:$0xff] }
  0x24   :  { %v174_v36 = vadd.f32 %v173_v27, %v172_v30  ;;  %v46_v27 = vld [vmem:[%s556_s0 + $0xf0] sm:$0xff]  ;;  %v73_v30 = vld [vmem:[%s556_s0 + $0x1c8] sm:$0xff] }
  0x25   :  { %v117_v38 = vadd.f32 %v116_v29, %v115_v32  ;;  %v195_v29 = vsel %vm80_vm1, %v71_v18, 0.0  ;;  %v140_v37 = vsel %vm80_vm1, %v46_v27, 0.0  ;;  %v199_v40 = vsel %vm80_vm1, %v73_v30, 0.0 }
  0x26   :  { %v176_v42 = vadd.f32 %v175_v33, %v174_v36  ;;  %v47_v33 = vld [vmem:[%s556_s0 + $0xf8] sm:$0xff]  ;;  %v74_v36 = vld [vmem:[%s556_s0 + $0x1d0] sm:$0xff] }
  0x27   :  { %v119_v44 = vadd.f32 %v118_v35, %v117_v38  ;;  %v197_v35 = vsel %vm80_vm1, %v72_v24, 0.0 }
  0x28   :  { %v178_v48 = vadd.f32 %v177_v39, %v176_v42  ;;  %v142_v42 = vsel %vm80_vm1, %v47_v33, 0.0 }
  0x29   :  { %v121_v50 = vadd.f32 %v120_v41, %v119_v44  ;;  %v75_v41 = vld [vmem:[%s556_s0 + $0x1d8] sm:$0xff] }
  0x2a   :  { %v180_v54 = vadd.f32 %v179_v45, %v178_v48  ;;  %v201_v45 = vsel %vm80_vm1, %v74_v36, 0.0  ;;  %v203_v49 = vsel %vm80_vm1, %v75_v41, 0.0 }
  0x2b   :  { %v123_v56 = vadd.f32 %v122_v47, %v121_v50  ;;  %v77_v50 = vld [vmem:[%s556_s0 + $0x1e8] sm:$0xff] }
  0x2c   :  { %v182_v60 = vadd.f32 %v181_v51, %v180_v54  ;;  %v78_v54 = vld [vmem:[%s556_s0 + $0x1f0] sm:$0xff] }
  0x2d   :  { %v125_v62 = vadd.f32 %v124_v53, %v123_v56  ;;  %v205_v53 = vsel %vm80_vm1, %v76_v46, 0.0  ;;  %v207_v56 = vsel %vm80_vm1, %v77_v50, 0.0 }
  0x2e   :  { %v184_v2 = vadd.f32 %v183_v57, %v182_v60  ;;  %v79_v57 = vld [vmem:[%s556_s0 + $0x1f8] sm:$0xff]  ;;  %v209_v60 = vsel %vm80_vm1, %v78_v54, 0.0  ;;  %s274_s0 = smov [#allocation3]  }
  0x2f   :  { %v127_v4 = vadd.f32 %v126_v59, %v125_v62  ;;  %v211_v62 = vsel %vm80_vm1, %v79_v57, 0.0  ;;  %s239_s18 = sshll.u32 %s274_s0, 4  ;;  %s240_s18 = int_to_ptr.vmem [resolvable:$true] %s239_s18 }
  0x30   :  { %v186_v8 = vadd.f32 %v185_v63, %v184_v2  ;;  %s249_s19 = scalar_lea.vmem %s240_s18, 32  ;;  %p254_p1 = scmp.lt.s32.totalorder %s240_s18, %s240_s18 }
  0x31   :  { %v129_v10 = vadd.f32 %v128_v1, %v127_v4  ;;  %p250_p0 = scmp.ne.s32.totalorder %s240_s18, %s249_s19  ;;  %p255_p2 = scmp.lt.s32.totalorder %s249_s19, %s249_s19 }
  0x32   :  { %v188_v14 = vadd.f32 %v187_v5, %v186_v8 }
  0x33   :  { %v131_v16 = vadd.f32 %v130_v7, %v129_v10  ;;  %v15_v10 = vld [vmem:[#allocation2] sm:$0x3]  ;;  %p256_p3 = por %p255_p2, %p254_p1 }
  0x34   :  { %v190_v20 = vadd.f32 %v189_v11, %v188_v14 }
  0x35   :  { %v133_v22 = vadd.f32 %v132_v13, %v131_v16  ;;  %p257_p4 = pnand %p256_p3, %p250_p0 }
  0x36   :  { %v192_v26 = vadd.f32 %v191_v17, %v190_v20 }
  0x37   :  { %v135_v28 = vadd.f32 %v134_v19, %v133_v22 }
  0x38   :  { %v194_v32 = vadd.f32 %v193_v23, %v192_v26 }
  0x39   :  { %v137_v34 = vadd.f32 %v136_v25, %v135_v28 }
  0x3a   :  { %v196_v38 = vadd.f32 %v195_v29, %v194_v32 }
  0x3b   :  { %v139_v39 = vadd.f32 %v138_v31, %v137_v34 }
  0x3c   :  { %v198_v43 = vadd.f32 %v197_v35, %v196_v38 }
  0x3d   :  { %v141_v44 = vadd.f32 %v140_v37, %v139_v39 }
  0x3e   :  { %v200_v47 = vadd.f32 %v199_v40, %v198_v43 }
  0x3f   :  { %v143_v48 = vadd.f32 %v142_v42, %v141_v44 }
  0x40   :  { %v202_v51 = vadd.f32 %v201_v45, %v200_v47 }
  0x41   :  { %v144_v52 = vrot.slane %v143_v48, 4 }
  0x42   :  { %v204_v55 = vadd.f32 %v203_v49, %v202_v51 }
  0x43   :  { %v145_v58 = vadd.f32 %v144_v52, %v143_v48 }
  0x44   :  { %v206_v59 = vadd.f32 %v205_v53, %v204_v55 }
  0x45   :  { %v146_v63 = vrot.slane %v145_v58, 2 }
  0x46   :  { %v208_v61 = vadd.f32 %v207_v56, %v206_v59 }
  0x47   :  { %v147_v2 = vadd.f32 %v146_v63, %v145_v58 }
  0x48   :  { %v210_v0 = vadd.f32 %v209_v60, %v208_v61 }
  0x49   :  { %v148_v5 = vrot.slane %v147_v2, 1 }
  0x4a   :  { %v212_v1 = vadd.f32 %v211_v62, %v210_v0 }
  0x4b   :  { %v149_v8 = vadd.f32 %v148_v5, %v147_v2 }
  0x4c   :  { %v213_v3 = vrot.slane %v212_v1, 4 }
  0x4e   :  { %v214_v4 = vadd.f32 %v213_v3, %v212_v1 }
  0x50   :  { %v215_v6 = vrot.slane %v214_v4, 2 }
  0x52   :  { %v216_v7 = vadd.f32 %v215_v6, %v214_v4 }
  0x54   :  { %v217_v9 = vrot.slane %v216_v7, 1 }
  0x56   :  { %v218_v11 = vadd.f32 %v217_v9, %v216_v7 }
  0x58   :  { %v222_v12 = vsel %vm221_vm2, %v218_v11, %v149_v8 }
  0x59   :  { %v224_v13 = vadd.f32 %v222_v12, %v15_v10 }
  0x5b   :  { %226 = vst.msk [vmem:[#allocation2] sm:$0x3] %vm13_vm0, %v224_v13 }
  0x62   :  { %v230_v14 = vld [vmem:[#allocation2] sm:$0x3] }
  0x63   :  { %v231_v15 = vmul.f32 0.00390625, %v230_v14 }
  0x65   :  { %232 = vst.msk [vmem:[#allocation3] sm:$0x3] %vm13_vm0, %v231_v15 }
  0x66   :  { %260 = shalt.err (!%p257_p4)
}
  0x67   :  { %s261_s22 = scalar_lea.hbm %s557_s1, 32 }
  0x68   :  { %p262_p5 = scmp.ne.s32.totalorder %s557_s1, %s261_s22  ;;  %p265_p6 = scmp.lt.u32.totalorder %s261_s22, %s557_s1 }
  0x6a   :  { %p267_p7 = pnand %p265_p6, %p262_p5 }
  0x6c   :  { %270 = shalt.err (!%p267_p7)
}
  0x6d   :  { %242 = dma.vmem_to_hbm [thread:$0]  %s240_s18, 32, %s557_s1, [#allocation4]  }
  0x6e   :  { %271 = dma.done.wait [#allocation4], 32  }
  0x6f   :  { %272 = vsyncadd [#allocation4], 4294967264 }
  0x70   :  { %246 = vsyncpa [#allocation4], 1 }

</bundles_post_ra>
